<compile_context>
chip_gen: v6e
topology: v6e:2x2x1
jax: 0.10.0
libtpu: 0.0.40
codegen_flags: <defaults>
</compile_context>

<pallas_src>
import jax
import jax.numpy as jnp
from jax.experimental import pallas as pl
from jax.experimental.pallas import tpu as pltpu


def _onehot_kernel(ids_ref, out_ref):
    # ids_ref : (1, S_TILE, 1)      int32 — token ids, on the sublane axis
    # out_ref : (1, S_TILE, V_TILE) dtype — lane-dense one-hot slab
    _, s_tile, v_tile = out_ref.shape
    v0 = pl.program_id(2) * v_tile                       # vocab-tile offset
    vocab_iota = jax.lax.broadcasted_iota(jnp.int32, (s_tile, v_tile), 1) + v0
    # (S_TILE, 1) == (S_TILE, V_TILE) broadcasts on the VPU: one cmp + select
    # per vreg, trivially hidden under the store stream.
    out_ref[0] = (ids_ref[0] == vocab_iota).astype(out_ref.dtype)


def sp_onehot_encode(ids: jax.Array,
                     vocab_size: int,
                     *,
                     dtype=jnp.float32,
                     s_tile: int = 256,
                     v_tile: int = 2048) -> jax.Array:
    """One-hot encode (B, S) int token ids into (B, S, V) `dtype`."""
    ids = ids.astype(jnp.int32)
    B, S = ids.shape
    V = int(vocab_size)

    # --- alignment & tile sizing ------------------------------------------
    # Vocab (lane) axis: multiple of 128 so stores are unmasked vst.
    V_pad = max(pl.cdiv(V, 128) * 128, 128)
    v_tile = min(v_tile, V_pad)                 # multiple of 128 by construction
    V_pad = pl.cdiv(V_pad, v_tile) * v_tile

    # Seq (sublane) axis: multiple of 8.
    S_pad = max(pl.cdiv(S, 8) * 8, 8)
    s_tile = min(s_tile, S_pad)                 # multiple of 8 by construction
    S_pad = pl.cdiv(S_pad, s_tile) * s_tile

    ids_p = ids
    if S_pad != S:
        # padded positions get id -1 -> all-zero one-hot rows (sliced away).
        ids_p = jnp.pad(ids_p, ((0, 0), (0, S_pad - S)), constant_values=-1)
    ids_p = ids_p[:, :, None]                   # (B, S_pad, 1)

    grid = (B, S_pad // s_tile, V_pad // v_tile)

    out = pl.pallas_call(
        _onehot_kernel,
        out_shape=jax.ShapeDtypeStruct((B, S_pad, V_pad), dtype),
        grid=grid,
        in_specs=[
            # only the needed id row-slice is DMA'd per step
            pl.BlockSpec((1, s_tile, 1), lambda b, s, v: (b, s, 0)),
        ],
        out_specs=pl.BlockSpec((1, s_tile, v_tile), lambda b, s, v: (b, s, v)),
        compiler_params=pltpu.CompilerParams(
            # every grid step is independent -> fully parallel (v7x 2-TC split)
            dimension_semantics=("parallel", "parallel", "parallel"),
        ),
    )(ids_p)

    if S_pad != S or V_pad != V:
        out = out[:, :S, :V]
    return out


class SpPipelinePallas:
    """JAX/Pallas analogue of spPipeline: token ids -> one-hot tensors."""

    def __init__(self, arg):
        if not isinstance(arg, dict):
            arg = vars(arg)
        self.vocab_size = int(arg.get("vocab_size", 128))
        self.dtype = arg.get("dtype", jnp.float32)

    def __call__(self, x):
        return sp_onehot_encode(x, self.vocab_size, dtype=self.dtype)


if __name__ == "__main__":
    key = jax.random.PRNGKey(0)

    # --- case 1: small, fully aligned shape (batch=2, seq=8, vocab=128) ----
    B, S, V = 2, 8, 128
    ids = jax.random.randint(key, (B, S), minval=0, maxval=V, dtype=jnp.int32)
    out = jax.block_until_ready(SpPipelinePallas({"vocab_size": V})(ids))
    ref = jax.nn.one_hot(ids, V, dtype=jnp.float32)
    assert out.shape == (B, S, V), out.shape
    assert jnp.allclose(out, ref), "mismatch vs jax.nn.one_hot (aligned case)"

    # --- case 2: unaligned seq/vocab exercises the pad + V-tile-offset path -
    B2, S2, V2 = 2, 10, 130
    key2 = jax.random.PRNGKey(1)
    ids2 = jax.random.randint(key2, (B2, S2), minval=0, maxval=V2, dtype=jnp.int32)
    out2 = jax.block_until_ready(sp_onehot_encode(ids2, V2))
    ref2 = jax.nn.one_hot(ids2, V2, dtype=jnp.float32)
    assert out2.shape == (B2, S2, V2), out2.shape
    assert jnp.allclose(out2, ref2), "mismatch vs jax.nn.one_hot (padded case)"

    # --- case 3: bf16 output (half the HBM store traffic) -------------------
    B3, S3, V3 = 2, 16, 256
    key3 = jax.random.PRNGKey(2)
    ids3 = jax.random.randint(key3, (B3, S3), minval=0, maxval=V3, dtype=jnp.int32)
    out3 = jax.block_until_ready(sp_onehot_encode(ids3, V3, dtype=jnp.bfloat16))
    ref3 = jax.nn.one_hot(ids3, V3, dtype=jnp.bfloat16)
    assert out3.shape == (B3, S3, V3), out3.shape
    assert jnp.allclose(out3.astype(jnp.float32), ref3.astype(jnp.float32)), \
        "mismatch vs jax.nn.one_hot (bf16 case)"

    print("KERNEL_OK")
</pallas_src>

<mosaic_0001>
module attributes {stable_mosaic.version = 11 : i64} {
  func.func @_onehot_kernel(%arg0: i32, %arg1: i32, %arg2: i32, %arg3: memref<1x8x1xi32, #tpu.memory_space<vmem>>, %arg4: memref<1x8x128xf32, #tpu.memory_space<vmem>>) attributes {dimension_semantics = [#tpu.dimension_semantics<parallel>, #tpu.dimension_semantics<parallel>, #tpu.dimension_semantics<parallel>], iteration_bounds = array<i64: 2, 1, 1>, scalar_prefetch = 0 : i64, scratch_operands = 0 : i64, tpu.core_type = #tpu.core_type<tc>, window_params = [{transform_indices = @transform_0, window_bounds = array<i64: 1, 8, 1>}, {transform_indices = @transform_1, window_bounds = array<i64: 1, 8, 128>}]} {
    %c128_i32 = arith.constant 128 : i32
    %0 = arith.muli %arg2, %c128_i32 : i32
    %1 = tpu.iota {dimensions = array<i32: 1>} : vector<8x128xi32>
    %2 = vector.broadcast %0 : i32 to vector<8x128xi32>
    %3 = arith.addi %1, %2 : vector<8x128xi32>
    %c0 = arith.constant 0 : index
    %c0_0 = arith.constant 0 : index
    %c0_1 = arith.constant 0 : index
    %4 = vector.load %arg3[%c0, %c0_0, %c0_1] : memref<1x8x1xi32, #tpu.memory_space<vmem>>, vector<1x8x1xi32>
    %5 = vector.shape_cast %4 : vector<1x8x1xi32> to vector<8x1xi32>
    %6 = vector.broadcast %5 : vector<8x1xi32> to vector<8x128xi32>
    %7 = arith.cmpi eq, %6, %3 : vector<8x128xi32>
    %8 = arith.extui %7 : vector<8x128xi1> to vector<8x128xi32>
    %9 = arith.sitofp %8 : vector<8x128xi32> to vector<8x128xf32>
    %c0_2 = arith.constant 0 : index
    %c0_3 = arith.constant 0 : index
    %c0_4 = arith.constant 0 : index
    %10 = vector.load %arg4[%c0_2, %c0_3, %c0_4] : memref<1x8x128xf32, #tpu.memory_space<vmem>>, vector<1x8x128xf32>
    %11 = vector.shape_cast %10 : vector<1x8x128xf32> to vector<8x128xf32>
    %12 = vector.shape_cast %9 : vector<8x128xf32> to vector<1x8x128xf32>
    tpu.vector_store %arg4[%c0_2, %c0_3, %c0_4], %12 {strides = array<i32>} : memref<1x8x128xf32, #tpu.memory_space<vmem>>, vector<1x8x128xf32>,
    return
  }
  func.func @transform_0(%arg0: i32, %arg1: i32, %arg2: i32) -> (i32, i32, i32) {
    %c0_i32 = arith.constant 0 : i32
    %c0_i32_0 = arith.constant 0 : i32
    return %arg0, %arg1, %c0_i32 : i32, i32, i32
  }
  func.func @transform_1(%arg0: i32, %arg1: i32, %arg2: i32) -> (i32, i32, i32) {
    %c0_i32 = arith.constant 0 : i32
    return %arg0, %arg1, %arg2 : i32, i32, i32
  }
}

</mosaic_0001>

<bundles_post_ra>
// kernel: tpu_custom_call.1
= control target key start
LH: loop header
LB: loop body
LE: loop exit
PB: predicated region body
PF: predicated region fallthrough
CT: control target
= control target key end

     0   :  { %6 = vsyncpa [#allocation3], 0  ;;  %s522_s0 = inlined_call_operand.vmem [shape: s32[2,8,1], index: 0, kind: input, shape index: {}]   ;;  %s523_s1 = inlined_call_operand.hbm [shape: f32[2,8,128], index: 1, kind: output, shape index: {}]  }
   0x1   :  { %8 = vsyncpa [#allocation3 + $0x1], 0  ;;  %s411_s6 = smov 0   ;;  %s413_s7 = smov 0  }
   0x2   :  { %s415_s8 = smov 0   ;;  %s417_s9 = smov 0  }
   0x3   :  { %s419_s10 = smov 0   ;;  %s421_s11 = smov 0  }
   0x4 LB: > { %s250_s12 = sadd.s32 4294967295, %s396_s11   ;;  %s251_s13 = sadd.s32 4294967294, %s396_s11   ;;  %s396_s11 = sphi %s421_s11, %s14_s11   ;;  %s392_s10 = sphi %s419_s10, %s530_s10   ;;  %s388_s9 = sphi %s417_s9, %s529_s9   ;;  %s384_s8 = sphi %s415_s8, %s528_s8   ;;  %s380_s7 = sphi %s413_s7, %s527_s7   ;;  %s376_s6 = sphi %s411_s6, %s526_s6  }
   0x5   : > { %s33_s14 = sadd.s32 1, %s392_s10  ;;  %s72_s15 = sadd.s32 1, %s384_s8 }
   0x6   : > { %p35_p0 = scmp.ge.s32.totalorder %s33_s14, 2  ;;  %p82_p1 = scmp.ne.s32.totalorder %s384_s8, %s380_s7 }
   0x7   : > { %p83_p2 = scmp.eq.s32.totalorder %s250_s12, 1  ;;  %p88_p3 = scmp.ne.s32.totalorder %s380_s7, %s376_s6 }
   0x8   : > { %s532_s14 = smov (%p35_p0, %s33_s14), 0  ;;  %p89_p5 = scmp.eq.s32.totalorder %s251_s13, 1 }
   0x9   : > { %p451_p4 = por %p83_p2, %p82_p1  ;;  %s65_s17 = ssub.s32 %s392_s10, %s532_s14 }
   0xa   : > { %p254_p6 = scmp.ge.s32.totalorder %s396_s11, 1  ;;  %p70_p7 = scmp.eq.s32.totalorder %s65_s17, 0 }
   0xb   : > { %p458_p8 = por %p89_p5, %p88_p3  ;;  %p117_p9 = scmp.lt.s32.totalorder %s396_s11, 3 }
   0xc   : > { %s464_s19 = scalar_select %p70_p7, %s384_s8, %s72_s15  }
   0xd   : > { %p118_p10 = pnand %p254_p6, %p117_p9 }
   0xe   : > { %p139_p11 = scmp.lt.s32.totalorder (!%p118_p10), %s388_s9, 1  ;;  %s136_s25 = sand.u32 (!%p118_p10), 1, %s380_s7  }
   0xf   : > { %121 = sbr.rel (%p118_p10) target bundleno = 164 (0xa4), region = 24  ;;  %s255_s26 = sshll.u32 (!%p118_p10), %s136_s25, 3 }
  0x10   : > { %s259_s27 = sshll.u32 (!%p118_p10), %s388_s9, 7  ;;  %s138_s28 = scalar_lea.vmem (!%p118_p10), [#allocation2], %s255_s26 }
  0x11   : > { %s175_s29 = sshll.u32 (!%p118_p10), %s138_s28, 4  ;;  %s476_s3 = scalar_lea.hbm (!%p118_p10), %s523_s1, %s259_s27  ;;  %s478_s29 = int_to_ptr.vmem [resolvable:$true] %s175_s29 }
  0x12   : > { %s160_s4 = scalar_lea.sflag (!%p118_p10), [#allocation3], %s136_s25  ;;  %s320_s5 = scalar_lea.vmem (!%p118_p10), %s478_s29, 128 }
  0x13   : > { %p321_p12 = scmp.ne.s32.totalorder (!%p118_p10), %s478_s29, %s320_s5 }
  0x14   : > { %v398_v0 = vmov 0   ;;  %s140_s20 = scalar_select %p139_p11, %s388_s9, 1  ;;  %v147_v2 = vlaneseq  ;;  %v399_v5 = vmov 0.0  }
  0x15   : > { %319 = vset.pattern.permute.xlu0 %v398_v0  ;;  %p322_p13 = pnand %p321_p12, %p451_p4  ;;  %s400_s9 = smov [#allocation2]  }
  0x16   : > { %s256_s21 = sshll.u32 %s140_s20, 3  ;;  %v148_v3 = vand.u32 127, %v147_v2  ;;  %s324_s12 = sshll.u32 %s400_s9, 4  ;;  %s325_s12 = int_to_ptr.vmem [resolvable:$false] %s324_s12 }
  0x17   : > { %s145_s24 = scalar_lea.vmem %s522_s0, %s256_s21  ;;  %p323_p0 = pneg %p322_p13 }
  0x18   : > { %v151_v1 = vld [vmem:[%s145_s24] sm:$0xff]  ;;  %s326_s13 = scalar_lea.vmem %s325_s12, 256  ;;  %p327_p1 = scmp.lt.s32.totalorder %s478_s29, %s325_s12 }
  0x19   : > { %153 = vperm.xlu0 %319, %v151_v1   ;;  %p328_p2 = scmp.lt.s32.totalorder %s326_s13, %s320_s5 }
  0x1b   : > { %p329_p3 = por %p328_p2, %p327_p1 }
  0x1d   : > { %p330_p5 = pnand %p329_p3, %p323_p0 }
  0x94   : > { %v154_v4 = vpop.permute.xlu0 %153 }
  0x95   : > { %vm155_vm0 = vcmp.eq.s32.totalorder %v154_v4, %v148_v3 }
  0x96   : > { %v257_v6 = vsel %vm155_vm0, 1.0, %v399_v5 }
  0x97   : > { %158 = vst [vmem:[%s138_s28] sm:$0xff] %v257_v6 }
  0x98   : > { %333 = shalt.err (!%p330_p5)
}
  0x99   : > { %s334_s15 = scalar_lea.hbm %s476_s3, 128  ;;  %s338_s21 = scalar_lea.hbm %s523_s1, 256 }
  0x9a   : > { %p335_p6 = scmp.ne.s32.totalorder %s476_s3, %s334_s15  ;;  %p339_p10 = scmp.lt.s32.totalorder %s476_s3, %s523_s1 }
  0x9b   : > { %p340_p11 = scmp.lt.s32.totalorder %s338_s21, %s334_s15 }
  0x9c   : > { %p336_p7 = pnand %p335_p6, %p451_p4 }
  0x9d   : > { %p341_p12 = por %p340_p11, %p339_p10 }
  0x9e   : > { %p337_p9 = pneg %p336_p7 }
  0xa0   : > { %p342_p13 = pnand %p341_p12, %p337_p9 }
  0xa2   : > { %345 = shalt.err (!%p342_p13)
}
  0xa3   : > { %262 = dma.vmem_to_hbm [thread:$0]  (%p451_p4), %s478_s29, 128, %s476_s3, %s160_s4  }
  0xa4 PF: > { %p268_p0 = scmp.ge.s32.totalorder %s396_s11, 2  ;;  %s187_s24 = sand.u32 1, %s376_s6  }
  0xa5   : > { %s188_s25 = scalar_lea.sflag [#allocation3], %s187_s24 }
  0xa6   : > { %p265_p1 = pnand %p268_p0, %p458_p8 }
  0xa8   : > { %p266_p2 = pneg %p265_p1 }
  0xaa   : > { %371 = dma.done.wait (%p266_p2), %s188_s25, 128  }
  0xab   : > { %373 = vsyncadd (%p266_p2), %s188_s25, 4294967168  ;;  %s14_s11 = sadd.s32 1, %s396_s11   ;;  %s526_s6 = smov %s380_s7 }
  0xac   : > { %p11_p3 = scmp.ge.s32.totalorder %s14_s11, 4   ;;  %s527_s7 = smov %s384_s8 }
  0xad   : > { %s528_s8 = smov %s464_s19  ;;  %s529_s9 = smov %s392_s10 }
  0xae   : > { %s530_s10 = smov %s532_s14  ;;  %13 = sbr.rel (!%p11_p3) target bundleno = 4 (0x4), region = 59 }
  0xb3   :  { %193 = vsyncpa [#allocation3], 1 }
  0xb4   :  { %195 = vsyncpa [#allocation3 + $0x1], 1 }

</bundles_post_ra>
